<compile_context>
chip_gen: v7x
topology: tpu7x:2x2x1
jax: 0.10.0
libtpu: 0.0.40
codegen_flags: <defaults>
</compile_context>

<pallas_src>
import functools

import jax
import jax.numpy as jnp
from jax.experimental import pallas as pl
from jax.experimental.pallas import tpu as pltpu


def relu_conv1x1_kernel(x_ref, w_ref, o_ref, *, mxu_bf16):
    # x_ref: (C_in, TM)   channels in sublanes, pixels in lanes (lane-dense)
    # w_ref: (C_out, C_in) resident in VMEM every grid step (constant index map)
    # o_ref: (C_out, TM)  lane-dense output -> unmasked vector stores
    x = jnp.maximum(x_ref[...], 0.0)  # fused ReLU, kept in f32 (v5e VPU has no bf16)
    w = w_ref[...]
    if mxu_bf16:
        x = x.astype(jnp.bfloat16)
        w = w.astype(jnp.bfloat16)
    o_ref[...] = jnp.dot(w, x, preferred_element_type=jnp.float32).astype(o_ref.dtype)


def _pick_tile(hw: int) -> int:
    """Lane-dense pixel tile size."""
    if hw <= 512:
        return hw            # single full block; nothing worth splitting
    if hw <= 4096:
        return 512           # >=2 tiles: v7x megacore + DMA/compute overlap
    return 2048              # amortize ~0.35us/step grid overhead at large HW


def relu_conv1x1(x_nchw, weight, *, mxu_bf16=False):
    """x_nchw: (N, C_in, H, W); weight: (C_out, C_in, 1, 1).

    Returns (N, C_out, H, W), same semantics as Conv2d(1x1, bias=False)(ReLU(x)).
    """
    N, C_in, H, W = x_nchw.shape
    C_out = weight.shape[0]
    HW = H * W

    # NCHW-native layout: no NCHW<->NHWC transposes, no weight transpose.
    x3d = x_nchw.reshape(N, C_in, HW)        # (N, C_in, HW)
    w2d = weight.reshape(C_out, C_in)        # (C_out, C_in)

    TM = _pick_tile(HW)
    grid = (N, pl.cdiv(HW, TM))

    itemsize = jnp.dtype(x_nchw.dtype).itemsize
    cost = pl.CostEstimate(
        flops=2 * N * HW * C_in * C_out,
        transcendentals=0,
        bytes_accessed=(x3d.size + w2d.size + N * C_out * HW) * itemsize,
    )

    kernel = functools.partial(relu_conv1x1_kernel, mxu_bf16=mxu_bf16)

    out3d = pl.pallas_call(
        kernel,
        out_shape=jax.ShapeDtypeStruct((N, C_out, HW), x_nchw.dtype),
        grid_spec=pl.GridSpec(
            grid=grid,
            in_specs=[
                # x tile: one (squeezed) batch element, all channels, TM pixels.
                pl.BlockSpec((None, C_in, TM), lambda n, m: (n, 0, m)),
                # weight: same full block every iteration -> stays in VMEM.
                pl.BlockSpec((C_out, C_in), lambda n, m: (0, 0)),
            ],
            out_specs=pl.BlockSpec((None, C_out, TM), lambda n, m: (n, 0, m)),
        ),
        compiler_params=pltpu.CompilerParams(
            # Both grid axes are independent -> shardable across v7x's 2 TCs.
            dimension_semantics=("parallel", "parallel"),
            # Explicit scoped-VMEM limit; worst case (TM=2048) uses < 6 MiB of
            # double-buffered blocks, so 32 MiB is safe on v5e/v6e/v7x alike.
            vmem_limit_bytes=32 * 1024 * 1024,
        ),
        cost_estimate=cost,
    )(x3d, w2d)

    # (N, C_out, HW) -> NCHW is a flat reshape, no transpose.
    return out3d.reshape(N, C_out, H, W)


if __name__ == "__main__":
    key = jax.random.PRNGKey(0)
    kx, kw = jax.random.split(key)

    # Shapes implied by the module: N=1, C=168, H=W=28.
    N, C, H, W = 1, 168, 28, 28
    x = jax.random.normal(kx, (N, C, H, W), dtype=jnp.float32)

    # Deterministic weight init for Conv2d(168, 168, 1, 1, bias=False).
    fan_in = C
    bound = 1.0 / (fan_in ** 0.5)
    weight = jax.random.uniform(
        kw, (C, C, 1, 1), dtype=jnp.float32, minval=-bound, maxval=bound
    )

    # Pure-JAX reference (ReLU then 1x1 conv as channel einsum).
    ref = jnp.einsum(
        "nchw,oc->nohw", jnp.maximum(x, 0.0), weight.reshape(C, C)
    )

    # Default (f32 MXU) path: exact module semantics.
    out = jax.block_until_ready(relu_conv1x1(x, weight))
    assert out.shape == (N, C, H, W)
    assert jnp.allclose(out, ref, atol=1e-4, rtol=1e-4)

    # Optional bf16-MXU path (higher throughput on large shapes); looser tol.
    out_bf16 = jax.block_until_ready(relu_conv1x1(x, weight, mxu_bf16=True))
    assert jnp.allclose(out_bf16, ref, atol=2e-2, rtol=2e-2)

    print("KERNEL_OK")
</pallas_src>

<mosaic_0001>
module attributes {stable_mosaic.version = 11 : i64} {
  func.func @relu_conv1x1_kernel(%arg0: i32, %arg1: i32, %arg2: memref<1x168x512xf32, #tpu.memory_space<vmem>>, %arg3: memref<168x168xf32, #tpu.memory_space<vmem>>, %arg4: memref<1x168x512xf32, #tpu.memory_space<vmem>>) attributes {dimension_semantics = [#tpu.dimension_semantics<parallel>, #tpu.dimension_semantics<parallel>], iteration_bounds = array<i64: 1, 2>, scalar_prefetch = 0 : i64, scratch_operands = 0 : i64, tpu.core_type = #tpu.core_type<tc>, window_params = [{transform_indices = @transform_0, window_bounds = array<i64: 1, 168, 512>}, {pipeline_mode = #tpu.pipeline_mode<synchronous>, transform_indices = @transform_1, window_bounds = array<i64: 168, 168>}, {transform_indices = @transform_2, window_bounds = array<i64: 1, 168, 512>}]} {
    %c0 = arith.constant 0 : index
    %c0_0 = arith.constant 0 : index
    %c0_1 = arith.constant 0 : index
    %0 = vector.load %arg2[%c0, %c0_0, %c0_1] : memref<1x168x512xf32, #tpu.memory_space<vmem>>, vector<1x168x512xf32>
    %1 = vector.shape_cast %0 : vector<1x168x512xf32> to vector<168x512xf32>
    %cst = arith.constant 0.000000e+00 : f32
    %2 = vector.broadcast %cst : f32 to vector<168x512xf32>
    %3 = arith.maximumf %1, %2 : vector<168x512xf32>
    %c0_2 = arith.constant 0 : index
    %c0_3 = arith.constant 0 : index
    %4 = vector.load %arg3[%c0_2, %c0_3] : memref<168x168xf32, #tpu.memory_space<vmem>>, vector<168x168xf32>
    %cst_4 = arith.constant dense<0.000000e+00> : vector<168x512xf32>
    %5 = tpu.matmul %4, %3, %cst_4 {dimension_numbers = #tpu.dot_dimension_numbers<[1], [0], [0], [1], [0, 0, 1, 1], [], []>} : vector<168x168xf32>, vector<168x512xf32>, vector<168x512xf32> -> vector<168x512xf32>
    %c0_5 = arith.constant 0 : index
    %c0_6 = arith.constant 0 : index
    %c0_7 = arith.constant 0 : index
    %6 = vector.load %arg4[%c0_5, %c0_6, %c0_7] : memref<1x168x512xf32, #tpu.memory_space<vmem>>, vector<1x168x512xf32>
    %7 = vector.shape_cast %6 : vector<1x168x512xf32> to vector<168x512xf32>
    %8 = vector.shape_cast %5 : vector<168x512xf32> to vector<1x168x512xf32>
    tpu.vector_store %arg4[%c0_5, %c0_6, %c0_7], %8 {strides = array<i32>} : memref<1x168x512xf32, #tpu.memory_space<vmem>>, vector<1x168x512xf32>,
    return
  }
  func.func @transform_0(%arg0: i32, %arg1: i32) -> (i32, i32, i32) {
    %c0_i32 = arith.constant 0 : i32
    %c0_i32_0 = arith.constant 0 : i32
    return %arg0, %c0_i32, %arg1 : i32, i32, i32
  }
  func.func @transform_1(%arg0: i32, %arg1: i32) -> (i32, i32) {
    %c0_i32 = arith.constant 0 : i32
    %c0_i32_0 = arith.constant 0 : i32
    %c0_i32_1 = arith.constant 0 : i32
    return %c0_i32, %c0_i32_0 : i32, i32
  }
  func.func @transform_2(%arg0: i32, %arg1: i32) -> (i32, i32, i32) {
    %c0_i32 = arith.constant 0 : i32
    %c0_i32_0 = arith.constant 0 : i32
    return %arg0, %c0_i32, %arg1 : i32, i32, i32
  }
}

</mosaic_0001>

<bundles_post_ra>
// kernel: tpu_custom_call.1
= control target key start
LH: loop header
LB: loop body
LE: loop exit
PB: predicated region body
PF: predicated region fallthrough
CT: control target
= control target key end

     0   :  { %7 = vsyncpa [#allocation3], 0  ;;  %s1917_s0 = inlined_call_operand.hbm [shape: f32[1,168,784], index: 0, kind: input, shape index: {}]   ;;  %s1918_s1 = inlined_call_operand.hbm [shape: f32[168,168], index: 1, kind: input, shape index: {}]   ;;  %s1919_s2 = inlined_call_operand.hbm [shape: f32[1,168,784], index: 2, kind: output, shape index: {}]  }
   0x1   :  { %9 = vsyncpa [#allocation3 + $0x1], 0 }
   0x2   :  { %10 = vsyncpa [#allocation6], 0 }
   0x3   :  { %11 = vsyncpa [#allocation4], 0 }
   0x4   :  { %13 = vsyncpa [#allocation4 + $0x1], 0  ;;  %s1459_s9 = smov 0   ;;  %s1461_s10 = smov 0  }
   0x5   :  { %s1463_s11 = smov 0   ;;  %s1465_s12 = smov 0  }
   0x6   :  { %s1467_s13 = smov 0   ;;  %s1469_s14 = smov 0  }
   0x7 LB: > { %s1072_s15 = sadd.s32 4294967295, %s1433_s14   ;;  %s1073_s16 = sadd.s32 4294967294, %s1433_s14   ;;  %s1433_s14 = sphi %s1469_s14, %s19_s14   ;;  %s1429_s13 = sphi %s1467_s13, %s1941_s13   ;;  %s1425_s12 = sphi %s1465_s12, %s1940_s12   ;;  %s1421_s11 = sphi %s1463_s11, %s1939_s11   ;;  %s1417_s10 = sphi %s1461_s10, %s1938_s10   ;;  %s1413_s9 = sphi %s1459_s9, %s1937_s9  }
   0x8   : > { %s28_s17 = sadd.s32 1, %s1429_s13  ;;  %s40_s18 = sadd.s32 1, %s1421_s11 }
   0x9   : > { %p29_p0 = scmp.ge.s32.totalorder %s28_s17, 2  ;;  %p47_p1 = scmp.ne.s32.totalorder %s1421_s11, %s1417_s10 }
   0xa   : > { %p48_p2 = scmp.eq.s32.totalorder %s1433_s14, 0  ;;  %p53_p3 = scmp.ne.s32.totalorder %s1417_s10, %s1413_s9 }
   0xb   : > { %s1943_s17 = smov (%p29_p0, %s28_s17), 0  ;;  %p1504_p5 = scmp.eq.s32.totalorder %s1072_s15, 0 }
   0xc   : > { %p1500_p4 = por %p48_p2, %p47_p1  ;;  %s36_s21 = ssub.s32 %s1429_s13, %s1943_s17 }
   0xd   : > { %s1925_s20 = scalar_select %p1504_p5, 1, 0 }
   0xe   : > { %s1924_s19 = scalar_select %p1500_p4, 1, 0 }
   0xf   : > { %p100_p6 = scmp.eq.s32.totalorder %s1072_s15, 1  ;;  %p38_p7 = scmp.eq.s32.totalorder %s36_s21, 0 }
  0x10   : > { %p1512_p8 = por %p1504_p5, %p53_p3  ;;  %p106_p10 = scmp.eq.s32.totalorder %s1073_s16, 1 }
  0x11   : > { %p1516_p9 = por %p100_p6, %p47_p1  ;;  %p1074_p12 = scmp.ge.s32.totalorder %s1433_s14, 1 }
  0x12   : > { %s1926_s22 = scalar_select %p1512_p8, 1, 0 }
  0x13   : > { %s1927_s23 = scalar_select %p1516_p9, 1, 0 }
  0x14   : > { %s1521_s24 = scalar_select %p38_p7, %s1421_s11, %s40_s18  }
  0x15   : > { %p1523_p11 = por %p106_p10, %p53_p3  ;;  %p113_p13 = scmp.lt.s32.totalorder %s1433_s14, 3 }
  0x16   : > { %s1435_s27 = smov [#allocation5]   ;;  %s1291_s4 = scalar_lea.hbm %s1918_s1, 5376 }
  0x17   : > { %s1928_s25 = scalar_select %p1523_p11, 1, 0 }
  0x18   : > { %p1529_p0 = pnand %p1074_p12, %p113_p13  ;;  %s125_s28 = sshll.u32 %s1435_s27, 4  ;;  %s126_s28 = int_to_ptr.vmem [resolvable:$true] %s125_s28 }
  0x19   : > { %p1292_p3 = scmp.ne.s32.totalorder %s1918_s1, %s1291_s4  ;;  %p1298_p12 = scmp.lt.u32.totalorder %s1291_s4, %s1918_s1 }
  0x1a   : > { %s1929_s26 = scalar_select %p1529_p0, 1, 0 }
  0x1b   : > { %p1225_p1 = pneg %p1529_p0 }
  0x1d   : > { %p1537_p2 = pnand %p1225_p1, %p1504_p5 }
  0x1f   : > { %p1293_p6 = pneg %p1537_p2 }
  0x21   : > { %p1294_p7 = pnand %p1293_p6, %p1292_p3 }
  0x23   : > { %p1295_p10 = pneg %p1294_p7 }
  0x25   : > { %p1300_p13 = pnand %p1298_p12, %p1295_p10 }
  0x27   : > { %1303 = shalt.err (!%p1300_p13)
}
  0x28   : > { %s1304_s15 = scalar_lea.vmem %s126_s28, 5376  ;;  %p1312_p5 = scmp.lt.s32.totalorder %s126_s28, %s126_s28 }
  0x29   : > { %p1305_p1 = scmp.ne.s32.totalorder %s126_s28, %s1304_s15  ;;  %p1313_p8 = scmp.lt.s32.totalorder %s1304_s15, %s1304_s15 }
  0x2b   : > { %p1307_p11 = pnand %p1305_p1, %p1293_p6  ;;  %p1314_p0 = por %p1313_p8, %p1312_p5 }
  0x2d   : > { %p1308_p9 = pneg %p1307_p11 }
  0x2f   : > { %p1315_p4 = pnand %p1314_p0, %p1308_p9 }
  0x31   : > { %1318 = shalt.err (!%p1315_p4)
}
  0x32   : > { %s1436_s16 = smov 256   ;;  %s1437_s18 = smov 16  }
  0x33   : > { %1228 = dma.hbm_to_vmem [thread:$0]  (!%p1537_p2), %s1918_s1, 5376, %s126_s28, [#allocation6], %s1436_s16, %s1436_s16, %s1437_s18  }
  0x34   : > { %p1076_p3 = scmp.ge.s32.totalorder %s1433_s14, 2 }
  0x35   : > { %p1931_p11 = scmp.ne.s32.totalorder (!%p1076_p3), %s1924_s19, 0 }
  0x36   : > { %135 = sbr.rel (%p1076_p3) target bundleno = 97 (0x61), region = 20 }
  0x3d   : > { %138 = sbr.rel (!%p1931_p11) target bundleno = 97 (0x61), region = 24  ;;  %s139_s30 = sand.u32 (%p1931_p11), 1, %s1421_s11  }
  0x3e   : > { %s1077_s3 = sshll.u32 (%p1931_p11), %s1429_s13, 2  ;;  %s1217_s4 = smul.u32 (%p1931_p11), 672, %s139_s30 }
  0x3f   : > { %s145_s5 = ssub.s32 (%p1931_p11), 7, %s1077_s3  ;;  %s1570_s6 = scalar_lea.sflag (%p1931_p11), [#allocation3], %s139_s30 }
  0x40   : > { %p146_p4 = scmp.lt.s32.totalorder (%p1931_p11), %s145_s5, 4  ;;  %s143_s7 = scalar_lea.vmem (%p1931_p11), [#allocation2], %s1217_s4 }
  0x44   : > { %s1945_s5 = smov (!%p146_p4, %s145_s5), 4 }
  0x45   : > { %s1567_s29 = smul.u32 2688, %s1945_s5 }
  0x47   : > { %s150_s28 = ssub.s32 10752, %s1567_s29 }
  0x48   : > { %151 = vsyncadd %s1570_s6, %s150_s28  ;;  %p1078_p5 = scmp.ne.s32.totalorder %s1567_s29, 0  ;;  %s1135_s19 = sshll.u32 %s1429_s13, 9 }
  0x49   : > { %s1578_s16 = scalar_lea.hbm %s1917_s0, %s1135_s19  ;;  %s1080_s18 = sshll.u32 %s1945_s5, 3 }
  0x4a   : > { %s159_s21 = sshll.u32 %s143_s7, 4  ;;  %s1319_s27 = scalar_lea.hbm %s1578_s16, %s1567_s29  ;;  %s1581_s21 = int_to_ptr.vmem [resolvable:$true] %s159_s21 }
  0x4b   : > { %p1320_p8 = scmp.ne.s32.totalorder %s1578_s16, %s1319_s27  ;;  %s1323_s4 = scalar_lea.hbm %s1917_s0, 18816 }
  0x4c   : > { %p1324_p2 = scmp.lt.u32.totalorder %s1578_s16, %s1917_s0  ;;  %p1325_p6 = scmp.lt.u32.totalorder %s1323_s4, %s1319_s27 }
  0x4d   : > { %p1321_p9 = pnand %p1320_p8, %p1078_p5  ;;  %p1327_p10 = scmp.lt.u32.totalorder %s1319_s27, %s1578_s16 }
  0x4e   : > { %p1326_p7 = por %p1325_p6, %p1324_p2 }
  0x4f   : > { %p1322_p0 = pneg %p1321_p9 }
  0x50   : > { %p1328_p12 = por %p1327_p10, %p1326_p7 }
  0x52   : > { %p1329_p13 = pnand %p1328_p12, %p1322_p0 }
  0x54   : > { %1332 = shalt.err (!%p1329_p13)
}
  0x55   : > { %s1333_s7 = scalar_lea.vmem %s1581_s21, %s1567_s29  ;;  %s1438_s8 = smov [#allocation2]  }
  0x56   : > { %p1334_p1 = scmp.ne.s32.totalorder %s1581_s21, %s1333_s7  ;;  %s1337_s15 = sshll.u32 %s1438_s8, 4  ;;  %s1338_s15 = int_to_ptr.vmem [resolvable:$false] %s1337_s15 }
  0x57   : > { %s1339_s30 = scalar_lea.vmem %s1338_s15, 21504  ;;  %p1340_p8 = scmp.lt.s32.totalorder %s1581_s21, %s1338_s15 }
  0x58   : > { %p1335_p11 = pnand %p1334_p1, %p1078_p5  ;;  %p1341_p9 = scmp.lt.s32.totalorder %s1339_s30, %s1333_s7 }
  0x5a   : > { %p1336_p4 = pneg %p1335_p11  ;;  %p1342_p2 = por %p1341_p9, %p1340_p8 }
  0x5c   : > { %p1343_p6 = pnand %p1342_p2, %p1336_p4 }
  0x5e   : > { %1346 = shalt.err (!%p1343_p6)
}
  0x5f   : > { %s1439_s27 = smov 896   ;;  %s1440_s3 = smov 512  }
  0x60   : > { %165 = dma.hbm_to_vmem [thread:$0]  (%p1078_p5), %s1578_s16, %s1567_s29, %s1581_s21, %s1570_s6, %s1439_s27, %s1440_s3, %s1080_s18  }
  0x61 PF: > { %p1932_p0 = scmp.ne.s32.totalorder %s1929_s26, 0 }
  0x62   : > { %s1613_s4 = sand.u32 (!%p1932_p0), 1, %s1417_s10   ;;  %p1933_p7 = scmp.ne.s32.totalorder (!%p1932_p0), %s1926_s22, 0 }
  0x63   : > { %171 = sbr.rel (%p1932_p0) target bundleno = 483 (0x1e3), region = 28  ;;  %s174_s19 = scalar_lea.sflag (!%p1932_p0), [#allocation3], %s1613_s4 }
  0x64   : > { %s1218_s28 = smul.u32 (!%p1932_p0), 672, %s1613_s4 }
  0x66   : > { %s1619_s7 = scalar_lea.vmem (!%p1932_p0), [#allocation2], %s1218_s28 }
  0x6a   : > { %1400 = dma.done.wait (%p1933_p7), %s174_s19, 10752  }
  0x6b   : > { %1402 = vsyncadd (%p1933_p7), %s174_s19, 4294956544  ;;  %p1934_p5 = scmp.ne.s32.totalorder %s1925_s20, 0 }
  0x6d   : > { %1404 = dma.done.wait (%p1934_p5), [#allocation6], 5376  }
  0x6e   : > { %1406 = vsyncadd (%p1934_p5), [#allocation6], 4294961920  ;;  %v213_v0 = vld [vmem:[%s1619_s7 + $0x8] sm:$0xff]  ;;  %v215_v2 = vld [vmem:[%s1619_s7 + $0x18] sm:$0xff]  ;;  %vm422_vm0 = vcmask 326656   ;;  %s1757_s20 = scalar_lea.vmem [#allocation7], %s1218_s28 }
  0x6f   : > { %v217_v1 = vld [vmem:[%s1619_s7 + $0x28] sm:$0xff]  ;;  %v297_v3 = vmax.f32 %v213_v0, 0.0  ;;  %v219_v5 = vld [vmem:[%s1619_s7 + $0x38] sm:$0xff]  ;;  %v299_v6 = vmax.f32 %v215_v2, 0.0  ;;  %v212_v7 = vld [vmem:[%s1619_s7] sm:$0xff]  ;;  %s953_s22 = scalar_lea.sflag [#allocation4], %s1613_s4 }
  0x70   : > { %v301_v4 = vmax.f32 %v217_v1, 0.0  ;;  %v216_v8 = vld [vmem:[%s1619_s7 + $0x20] sm:$0xff]  ;;  %v303_v9 = vmax.f32 %v219_v5, 0.0  ;;  %v296_v10 = vmax.f32 %v212_v7, 0.0  ;;  %v214_v12 = vld [vmem:[%s1619_s7 + $0x10] sm:$0xff]  ;;  %v221_v14 = vld [vmem:[%s1619_s7 + $0x48] sm:$0xff] }
  0x71   : > { %v300_v11 = vmax.f32 %v216_v8, 0.0  ;;  %v218_v13 = vld [vmem:[%s1619_s7 + $0x30] sm:$0xff]  ;;  %v298_v16 = vmax.f32 %v214_v12, 0.0  ;;  %v225_v18 = vld [vmem:[%s1619_s7 + $0x68] sm:$0xff]  ;;  %v305_v19 = vmax.f32 %v221_v14, 0.0  ;;  %v223_v20 = vld [vmem:[%s1619_s7 + $0x58] sm:$0xff] }
  0x72   : > { %v1137_v15 = vpack.c.bf16 %v301_v4, %v297_v3  ;;  %v302_v17 = vmax.f32 %v218_v13, 0.0  ;;  %v227_v21 = vld [vmem:[%s1619_s7 + $0x78] sm:$0xff]  ;;  %v1177_v22 = vpack.c.bf16 %v303_v9, %v299_v6  ;;  %v309_v24 = vmax.f32 %v225_v18, 0.0  ;;  %v220_v26 = vld [vmem:[%s1619_s7 + $0x40] sm:$0xff]  ;;  %v222_v28 = vld [vmem:[%s1619_s7 + $0x50] sm:$0xff]  ;;  %p1935_p10 = scmp.ne.s32.totalorder %s1927_s23, 0 }
  0x73   : > { %v1139_v23 = vpack.c.bf16 %v300_v11, %v296_v10  ;;  %v307_v25 = vmax.f32 %v223_v20, 0.0  ;;  %v224_v27 = vld [vmem:[%s1619_s7 + $0x60] sm:$0xff]  ;;  %v311_v30 = vmax.f32 %v227_v21, 0.0  ;;  %v304_v31 = vmax.f32 %v220_v26, 0.0  ;;  %v226_v33 = vld [vmem:[%s1619_s7 + $0x70] sm:$0xff]  ;;  %v229_v34 = vld [vmem:[%s1619_s7 + $0x88] sm:$0xff] }
  0x74   : > { %1138 = vmatprep.subr.bf16.mxu0 %v1137_v15  ;;  %v1179_v29 = vpack.c.bf16 %v302_v17, %v298_v16  ;;  %v308_v32 = vmax.f32 %v224_v27, 0.0  ;;  %v233_v35 = vld [vmem:[%s1619_s7 + $0xa8] sm:$0xff]  ;;  %1178 = vmatprep.subr.bf16.mxu1 %v1177_v22  ;;  %v1141_v36 = vpack.c.bf16 %v309_v24, %v305_v19  ;;  %v306_v37 = vmax.f32 %v222_v28, 0.0  ;;  %v231_v40 = vld [vmem:[%s1619_s7 + $0x98] sm:$0xff]  ;;  %v228_v42 = vld [vmem:[%s1619_s7 + $0x80] sm:$0xff]  ;;  %s1127_s26 = sshll.u32 (%p1935_p10), %s1425_s12, 2 }
  0x75   : > { %1140 = vmatpush1.bf16.msra.mxu0 %v1139_v23  ;;  %v310_v38 = vmax.f32 %v226_v33, 0.0  ;;  %v313_v39 = vmax.f32 %v229_v34, 0.0  ;;  %v235_v41 = vld [vmem:[%s1619_s7 + $0xb8] sm:$0xff]  ;;  %v1181_v43 = vpack.c.bf16 %v311_v30, %v307_v25  ;;  %v317_v45 = vmax.f32 %v233_v35, 0.0  ;;  %v232_v47 = vld [vmem:[%s1619_s7 + $0xa0] sm:$0xff]  ;;  %v230_v48 = vld [vmem:[%s1619_s7 + $0x90] sm:$0xff] }
  0x76   : > { %1180 = vmatpush1.bf16.msra.mxu1 %v1179_v29  ;;  %v1143_v44 = vpack.c.bf16 %v308_v32, %v304_v31  ;;  %v315_v46 = vmax.f32 %v231_v40, 0.0  ;;  %v234_v49 = vld [vmem:[%s1619_s7 + $0xb0] sm:$0xff]  ;;  %1142 = vmatprep.subr.bf16.mxu0 %v1141_v36  ;;  %v319_v51 = vmax.f32 %v235_v41, 0.0  ;;  %v312_v52 = vmax.f32 %v228_v42, 0.0  ;;  %v237_v54 = vld [vmem:[%s1619_s7 + $0xc8] sm:$0xff]  ;;  %v239_v56 = vld [vmem:[%s1619_s7 + $0xd8] sm:$0xff] }
  0x77   : > { %v1183_v50 = vpack.c.bf16 %v310_v38, %v306_v37  ;;  %v316_v53 = vmax.f32 %v232_v47, 0.0  ;;  %v241_v55 = vld [vmem:[%s1619_s7 + $0xe8] sm:$0xff]  ;;  %1182 = vmatprep.subr.bf16.mxu1 %v1181_v43  ;;  %v1145_v57 = vpack.c.bf16 %v317_v45, %v313_v39  ;;  %v314_v58 = vmax.f32 %v230_v48, 0.0  ;;  %v243_v61 = vld [vmem:[%s1619_s7 + $0xf8] sm:$0xff]  ;;  %v236_v62 = vld [vmem:[%s1619_s7 + $0xc0] sm:$0xff]  ;;  %s961_s5 = ssub.s32 (%p1935_p10), 7, %s1127_s26 }
  0x78   : > { %v318_v59 = vmax.f32 %v234_v49, 0.0  ;;  %v321_v60 = vmax.f32 %v237_v54, 0.0  ;;  %v240_v63 = vld [vmem:[%s1619_s7 + $0xe0] sm:$0xff]  ;;  %v1185_v0 = vpack.c.bf16 %v319_v51, %v315_v46  ;;  %v325_v2 = vmax.f32 %v241_v55, 0.0  ;;  %v238_v4 = vld [vmem:[%s1619_s7 + $0xd0] sm:$0xff]  ;;  %v245_v6 = vld [vmem:[%s1619_s7 + $0x108] sm:$0xff] }
  0x79   : > { %1144 = vmatpush1.bf16.msra.mxu0 %v1143_v44  ;;  %v1147_v1 = vpack.c.bf16 %v316_v53, %v312_v52  ;;  %v323_v3 = vmax.f32 %v239_v56, 0.0  ;;  %v242_v5 = vld [vmem:[%s1619_s7 + $0xf0] sm:$0xff]  ;;  %v327_v8 = vmax.f32 %v243_v61, 0.0  ;;  %v320_v9 = vmax.f32 %v236_v62, 0.0  ;;  %v249_v11 = vld [vmem:[%s1619_s7 + $0x128] sm:$0xff]  ;;  %v247_v12 = vld [vmem:[%s1619_s7 + $0x118] sm:$0xff] }
  0x7a   : > { %1184 = vmatpush1.bf16.msra.mxu1 %v1183_v50  ;;  %1146 = vmatprep.subr.bf16.mxu0 %v1145_v57  ;;  %v1187_v7 = vpack.c.bf16 %v318_v59, %v314_v58  ;;  %v324_v10 = vmax.f32 %v240_v63, 0.0  ;;  %v251_v13 = vld [vmem:[%s1619_s7 + $0x138] sm:$0xff]  ;;  %v1149_v14 = vpack.c.bf16 %v325_v2, %v321_v60  ;;  %v322_v15 = vmax.f32 %v238_v4, 0.0  ;;  %v244_v18 = vld [vmem:[%s1619_s7 + $0x100] sm:$0xff]  ;;  %v246_v20 = vld [vmem:[%s1619_s7 + $0x110] sm:$0xff]  ;;  %p962_p12 = scmp.lt.s32.totalorder (%p1935_p10), %s961_s5, 4 }
  0x7b   : > { %1186 = vmatprep.subr.bf16.mxu1 %v1185_v0  ;;  %v326_v16 = vmax.f32 %v242_v5, 0.0  ;;  %v329_v17 = vmax.f32 %v245_v6, 0.0  ;;  %v248_v19 = vld [vmem:[%s1619_s7 + $0x120] sm:$0xff]  ;;  %v1189_v21 = vpack.c.bf16 %v327_v8, %v323_v3  ;;  %v333_v23 = vmax.f32 %v249_v11, 0.0  ;;  %v250_v25 = vld [vmem:[%s1619_s7 + $0x130] sm:$0xff]  ;;  %v253_v26 = vld [vmem:[%s1619_s7 + $0x148] sm:$0xff] }
  0x7c   : > { %v1151_v22 = vpack.c.bf16 %v324_v10, %v320_v9  ;;  %v331_v24 = vmax.f32 %v247_v12, 0.0  ;;  %v257_v27 = vld [vmem:[%s1619_s7 + $0x168] sm:$0xff]  ;;  %v335_v29 = vmax.f32 %v251_v13, 0.0  ;;  %v328_v30 = vmax.f32 %v244_v18, 0.0  ;;  %v255_v32 = vld [vmem:[%s1619_s7 + $0x158] sm:$0xff]  ;;  %v252_v34 = vld [vmem:[%s1619_s7 + $0x140] sm:$0xff] }
  0x7d   : > { %1148 = vmatpush1.bf16.msra.mxu0 %v1147_v1  ;;  %v1191_v28 = vpack.c.bf16 %v326_v16, %v322_v15  ;;  %v332_v31 = vmax.f32 %v248_v19, 0.0  ;;  %v259_v33 = vld [vmem:[%s1619_s7 + $0x178] sm:$0xff]  ;;  %v1153_v35 = vpack.c.bf16 %v333_v23, %v329_v17  ;;  %v330_v36 = vmax.f32 %v246_v20, 0.0  ;;  %v256_v39 = vld [vmem:[%s1619_s7 + $0x160] sm:$0xff]  ;;  %v254_v40 = vld [vmem:[%s1619_s7 + $0x150] sm:$0xff] }
  0x7e   : > { %1188 = vmatpush1.bf16.msra.mxu1 %v1187_v7  ;;  %1150 = vmatprep.subr.bf16.mxu0 %v1149_v14  ;;  %v334_v37 = vmax.f32 %v250_v25, 0.0  ;;  %v337_v38 = vmax.f32 %v253_v26, 0.0  ;;  %v258_v41 = vld [vmem:[%s1619_s7 + $0x170] sm:$0xff]  ;;  %v1193_v42 = vpack.c.bf16 %v335_v29, %v331_v24  ;;  %v341_v43 = vmax.f32 %v257_v27, 0.0  ;;  %v261_v45 = vld [vmem:[%s1619_s7 + $0x188] sm:$0xff]  ;;  %v263_v49 = vld [vmem:[%s1619_s7 + $0x198] sm:$0xff] }
  0x7f   : > { %1190 = vmatprep.subr.bf16.mxu1 %v1189_v21  ;;  %v339_v44 = vmax.f32 %v255_v32, 0.0  ;;  %v265_v46 = vld [vmem:[%s1619_s7 + $0x1a8] sm:$0xff]  ;;  %v1155_v47 = vpack.c.bf16 %v332_v31, %v328_v30  ;;  %v343_v48 = vmax.f32 %v259_v33, 0.0  ;;  %v267_v50 = vld [vmem:[%s1619_s7 + $0x1b8] sm:$0xff]  ;;  %v336_v51 = vmax.f32 %v252_v34, 0.0  ;;  %v260_v55 = vld [vmem:[%s1619_s7 + $0x180] sm:$0xff] }
  0x80   : > { %v340_v52 = vmax.f32 %v256_v39, 0.0  ;;  %v338_v53 = vmax.f32 %v254_v40, 0.0  ;;  %v342_v54 = vmax.f32 %v258_v41, 0.0  ;;  %v264_v56 = vld [vmem:[%s1619_s7 + $0x1a0] sm:$0xff]  ;;  %v1195_v57 = vpack.c.bf16 %v334_v37, %v330_v36  ;;  %v262_v61 = vld [vmem:[%s1619_s7 + $0x190] sm:$0xff]  ;;  %v269_v2 = vld [vmem:[%s1619_s7 + $0x1c8] sm:$0xff] }
  0x81   : > { %1152 = vmatpush1.bf16.msra.mxu0 %v1151_v22  ;;  %v1157_v58 = vpack.c.bf16 %v341_v43, %v337_v38  ;;  %v345_v59 = vmax.f32 %v261_v45, 0.0  ;;  %v349_v60 = vmax.f32 %v265_v46, 0.0  ;;  %v1197_v62 = vpack.c.bf16 %v343_v48, %v339_v44  ;;  %v266_v1 = vld [vmem:[%s1619_s7 + $0x1b0] sm:$0xff]  ;;  %v273_v3 = vld [vmem:[%s1619_s7 + $0x1e8] sm:$0xff]  ;;  %v271_v6 = vld [vmem:[%s1619_s7 + $0x1d8] sm:$0xff] }
  0x82   : > { %1192 = vmatpush1.bf16.msra.mxu1 %v1191_v28  ;;  %1154 = vmatprep.subr.bf16.mxu0 %v1153_v35  ;;  %v347_v63 = vmax.f32 %v263_v49, 0.0  ;;  %v351_v0 = vmax.f32 %v267_v50, 0.0  ;;  %v344_v4 = vmax.f32 %v260_v55, 0.0  ;;  %v348_v5 = vmax.f32 %v264_v56, 0.0  ;;  %v275_v7 = vld [vmem:[%s1619_s7 + $0x1f8] sm:$0xff]  ;;  %v268_v11 = vld [vmem:[%s1619_s7 + $0x1c0] sm:$0xff] }
  0x83   : > { %1194 = vmatprep.subr.bf16.mxu1 %v1193_v42  ;;  %v1159_v8 = vpack.c.bf16 %v340_v52, %v336_v51  ;;  %v1199_v9 = vpack.c.bf16 %v342_v54, %v338_v53  ;;  %v346_v10 = vmax.f32 %v262_v61, 0.0  ;;  %v272_v12 = vld [vmem:[%s1619_s7 + $0x1e0] sm:$0xff]  ;;  %v270_v13 = vld [vmem:[%s1619_s7 + $0x1d0] sm:$0xff]  ;;  %v1161_v14 = vpack.c.bf16 %v349_v60, %v345_v59  ;;  %v277_v19 = vld [vmem:[%s1619_s7 + $0x208] sm:$0xff] }
  0x84   : > { %v350_v15 = vmax.f32 %v266_v1, 0.0  ;;  %v353_v16 = vmax.f32 %v269_v2, 0.0  ;;  %v357_v17 = vmax.f32 %v273_v3, 0.0  ;;  %v274_v18 = vld [vmem:[%s1619_s7 + $0x1f0] sm:$0xff]  ;;  %v281_v20 = vld [vmem:[%s1619_s7 + $0x228] sm:$0xff]  ;;  %v1201_v21 = vpack.c.bf16 %v351_v0, %v347_v63  ;;  %v279_v27 = vld [vmem:[%s1619_s7 + $0x218] sm:$0xff] }
  0x85   : > { %1156 = vmatpush1.bf16.msra.mxu0 %v1155_v47  ;;  %v355_v22 = vmax.f32 %v271_v6, 0.0  ;;  %v359_v23 = vmax.f32 %v275_v7, 0.0  ;;  %v1163_v24 = vpack.c.bf16 %v348_v5, %v344_v4  ;;  %v352_v25 = vmax.f32 %v268_v11, 0.0  ;;  %v283_v28 = vld [vmem:[%s1619_s7 + $0x238] sm:$0xff]  ;;  %v276_v33 = vld [vmem:[%s1619_s7 + $0x200] sm:$0xff]  ;;  %v278_v37 = vld [vmem:[%s1619_s7 + $0x210] sm:$0xff] }
  0x86   : > { %1196 = vmatpush1.bf16.msra.mxu1 %v1195_v57  ;;  %1158 = vmatprep.subr.bf16.mxu0 %v1157_v58  ;;  %v356_v26 = vmax.f32 %v272_v12, 0.0  ;;  %v354_v29 = vmax.f32 %v270_v13, 0.0  ;;  %v358_v30 = vmax.f32 %v274_v18, 0.0  ;;  %v361_v31 = vmax.f32 %v277_v19, 0.0  ;;  %v280_v36 = vld [vmem:[%s1619_s7 + $0x220] sm:$0xff]  ;;  %v381_v38 = vld [vmem:[#allocation5 + $0x8] sm:$0xff] }
  0x87   : > { %1198 = vmatprep.subr.bf16.mxu1 %v1197_v62  ;;  %v365_v32 = vmax.f32 %v281_v20, 0.0  ;;  %v1203_v34 = vpack.c.bf16 %v350_v15, %v346_v10  ;;  %v1165_v35 = vpack.c.bf16 %v357_v17, %v353_v16  ;;  %v1205_v39 = vpack.c.bf16 %v359_v23, %v355_v22  ;;  %v282_v42 = vld [vmem:[%s1619_s7 + $0x230] sm:$0xff]  ;;  %v285_v43 = vld [vmem:[%s1619_s7 + $0x248] sm:$0xff]  ;;  %1085 = vmatprep.mubr.msk.f32.mxu0 %vm422_vm0, %v381_v38  ;;  %v287_v46 = vld [vmem:[%s1619_s7 + $0x258] sm:$0xff] }
  0x88   : > { %v363_v40 = vmax.f32 %v279_v27, 0.0  ;;  %v367_v41 = vmax.f32 %v283_v28, 0.0  ;;  %v289_v44 = vld [vmem:[%s1619_s7 + $0x268] sm:$0xff]  ;;  %v1167_v45 = vpack.c.bf16 %v356_v26, %v352_v25  ;;  %v291_v47 = vld [vmem:[%s1619_s7 + $0x278] sm:$0xff]  ;;  %1106 = vmatprep.mubr.msk.f32.mxu1 %vm422_vm0, %v381_v38  ;;  %v1207_v48 = vpack.c.bf16 %v358_v30, %v354_v29  ;;  %v284_v56 = vld [vmem:[%s1619_s7 + $0x240] sm:$0xff] }
  0x89   : > { %1160 = vmatpush1.bf16.msra.mxu0 %v1159_v8  ;;  %v1169_v49 = vpack.c.bf16 %v365_v32, %v361_v31  ;;  %v360_v50 = vmax.f32 %v276_v33, 0.0  ;;  %v364_v51 = vmax.f32 %v280_v36, 0.0  ;;  %v362_v52 = vmax.f32 %v278_v37, 0.0  ;;  %v288_v57 = vld [vmem:[%s1619_s7 + $0x260] sm:$0xff]  ;;  %v286_v61 = vld [vmem:[%s1619_s7 + $0x250] sm:$0xff]  ;;  %v293_v7 = vld [vmem:[%s1619_s7 + $0x288] sm:$0xff] }
  0x8a   : > { %1200 = vmatpush1.bf16.msra.mxu1 %v1199_v9  ;;  %1162 = vmatprep.subr.bf16.mxu0 %v1161_v14  ;;  %v366_v53 = vmax.f32 %v282_v42, 0.0  ;;  %v369_v54 = vmax.f32 %v285_v43, 0.0  ;;  %v373_v55 = vmax.f32 %v289_v44, 0.0  ;;  %v1209_v58 = vpack.c.bf16 %v367_v41, %v363_v40  ;;  %v290_v62 = vld [vmem:[%s1619_s7 + $0x270] sm:$0xff]  ;;  %v295_v8 = vld [vmem:[%s1619_s7 + $0x298] sm:$0xff]  ;;  %v292_v12 = vld [vmem:[%s1619_s7 + $0x280] sm:$0xff] }
  0x8b   : > { %1202 = vmatprep.subr.bf16.mxu1 %v1201_v21  ;;  %v371_v59 = vmax.f32 %v287_v46, 0.0  ;;  %v375_v60 = vmax.f32 %v291_v47, 0.0  ;;  %v1171_v63 = vpack.c.bf16 %v364_v51, %v360_v50  ;;  %v368_v0 = vmax.f32 %v284_v56, 0.0  ;;  %v294_v14 = vld [vmem:[%s1619_s7 + $0x290] sm:$0xff]  ;;  %v380_v17 = vld [vmem:[#allocation5] sm:$0xff]  ;;  %v383_v18 = vld [vmem:[#allocation5 + $0x18] sm:$0xff] }
  0x8c   : > { %v372_v1 = vmax.f32 %v288_v57, 0.0  ;;  %v1211_v2 = vpack.c.bf16 %v366_v53, %v362_v52  ;;  %v1173_v3 = vpack.c.bf16 %v373_v55, %v369_v54  ;;  %v370_v4 = vmax.f32 %v286_v61, 0.0  ;;  %v382_v19 = vld [vmem:[#allocation5 + $0x10] sm:$0xff]  ;;  %v385_v20 = vld [vmem:[#allocation5 + $0x28] sm:$0xff]  ;;  %v384_v21 = vld [vmem:[#allocation5 + $0x20] sm:$0xff] }
  0x8d   : > { %1164 = vmatpush1.bf16.msra.mxu0 %v1163_v24  ;;  %v374_v5 = vmax.f32 %v290_v62, 0.0  ;;  %v1213_v6 = vpack.c.bf16 %v375_v60, %v371_v59  ;;  %v377_v11 = vmax.f32 %v293_v7, 0.0  ;;  %v379_v13 = vmax.f32 %v295_v8, 0.0  ;;  %v387_v22 = vld [vmem:[#allocation5 + $0x38] sm:$0xff]  ;;  %v386_v23 = vld [vmem:[#allocation5 + $0x30] sm:$0xff]  ;;  %v389_v24 = vld [vmem:[#allocation5 + $0x48] sm:$0xff] }
  0x8e   : > { %1204 = vmatpush1.bf16.msra.mxu1 %v1203_v34  ;;  %1166 = vmatprep.subr.bf16.mxu0 %v1165_v35  ;;  %v1175_v9 = vpack.c.bf16 %v372_v1, %v368_v0  ;;  %v376_v15 = vmax.f32 %v292_v12, 0.0  ;;  %v378_v16 = vmax.f32 %v294_v14, 0.0  ;;  %v388_v25 = vld [vmem:[#allocation5 + $0x40] sm:$0xff]  ;;  %v391_v26 = vld [vmem:[#allocation5 + $0x58] sm:$0xff]  ;;  %v390_v27 = vld [vmem:[#allocation5 + $0x50] sm:$0xff] }
  0x8f   : > { %1206 = vmatprep.subr.bf16.mxu1 %v1205_v39  ;;  %v1215_v10 = vpack.c.bf16 %v374_v5, %v370_v4  ;;  %v393_v28 = vld [vmem:[#allocation5 + $0x68] sm:$0xff]  ;;  %v392_v29 = vld [vmem:[#allocation5 + $0x60] sm:$0xff]  ;;  %v395_v30 = vld [vmem:[#allocation5 + $0x78] sm:$0xff] }
  0x90   : > { %v394_v31 = vld [vmem:[#allocation5 + $0x70] sm:$0xff]  ;;  %v397_v32 = vld [vmem:[#allocation5 + $0x88] sm:$0xff]  ;;  %v396_v33 = vld [vmem:[#allocation5 + $0x80] sm:$0xff] }
  0x91   : > { %1168 = vmatpush1.bf16.msra.mxu0 %v1167_v45  ;;  %v399_v34 = vld [vmem:[#allocation5 + $0x98] sm:$0xff]  ;;  %v398_v35 = vld [vmem:[#allocation5 + $0x90] sm:$0xff]  ;;  %v401_v36 = vld [vmem:[#allocation5 + $0xa8] sm:$0xff] }
  0x92   : > { %1208 = vmatpush1.bf16.msra.mxu1 %v1207_v48  ;;  %1170 = vmatprep.subr.bf16.mxu0 %v1169_v49  ;;  %v400_v37 = vld [vmem:[#allocation5 + $0xa0] sm:$0xff]  ;;  %v403_v38 = vld [vmem:[#allocation5 + $0xb8] sm:$0xff]  ;;  %v402_v39 = vld [vmem:[#allocation5 + $0xb0] sm:$0xff] }
  0x93   : > { %1210 = vmatprep.subr.bf16.mxu1 %v1209_v58  ;;  %v405_v40 = vld [vmem:[#allocation5 + $0xc8] sm:$0xff]  ;;  %v404_v41 = vld [vmem:[#allocation5 + $0xc0] sm:$0xff]  ;;  %v407_v42 = vld [vmem:[#allocation5 + $0xd8] sm:$0xff] }
  0x94   : > { %v406_v43 = vld [vmem:[#allocation5 + $0xd0] sm:$0xff]  ;;  %v409_v44 = vld [vmem:[#allocation5 + $0xe8] sm:$0xff]  ;;  %v408_v45 = vld [vmem:[#allocation5 + $0xe0] sm:$0xff] }
  0x95   : > { %1172 = vmatpush1.bf16.msra.mxu0 %v1171_v63  ;;  %v411_v46 = vld [vmem:[#allocation5 + $0xf8] sm:$0xff]  ;;  %v410_v47 = vld [vmem:[#allocation5 + $0xf0] sm:$0xff]  ;;  %v413_v48 = vld [vmem:[#allocation5 + $0x108] sm:$0xff] }
  0x96   : > { %1212 = vmatpush1.bf16.msra.mxu1 %v1211_v2  ;;  %1174 = vmatprep.subr.bf16.mxu0 %v1173_v3  ;;  %v412_v49 = vld [vmem:[#allocation5 + $0x100] sm:$0xff]  ;;  %v415_v50 = vld [vmem:[#allocation5 + $0x118] sm:$0xff]  ;;  %v414_v51 = vld [vmem:[#allocation5 + $0x110] sm:$0xff] }
  0x97   : > { %1214 = vmatprep.subr.bf16.mxu1 %v1213_v6  ;;  %v417_v52 = vld [vmem:[#allocation5 + $0x128] sm:$0xff]  ;;  %v416_v53 = vld [vmem:[#allocation5 + $0x120] sm:$0xff]  ;;  %v419_v54 = vld [vmem:[#allocation5 + $0x138] sm:$0xff] }
  0x98   : > { %v418_v55 = vld [vmem:[#allocation5 + $0x130] sm:$0xff]  ;;  %v421_v56 = vld [vmem:[#allocation5 + $0x148] sm:$0xff]  ;;  %v420_v57 = vld [vmem:[#allocation5 + $0x140] sm:$0xff] }
  0x99   : > { %1176 = vmatpush1.bf16.msra.mxu0 %v1175_v9 }
  0x9a   : > { %1216 = vmatpush1.bf16.msra.mxu1 %v1215_v10  ;;  %526 = vmatprep.subr.mxu0 %v377_v11 }
  0x9b   : > { %717 = vmatprep.subr.mxu1 %v379_v13 }
  0x9d   : > { %527 = vmatpush1.msra.mxu0 %v376_v15 }
  0x9e   : > { %718 = vmatpush1.msra.mxu1 %v378_v16  ;;  %551 = vmatmul.mubr.f32.vlgmr.msra.gmra.mrb[0].mxu0 %v380_v17 }
  0x9f   : > { %742 = vmatmul.mubr.f32.vlgmr.msra.gmra.mrb[0].mxu1 %v380_v17  ;;  %1086 = vmatprep.mubr.msk.f32.mxu0 %vm422_vm0, %v383_v18 }
  0xa0   : > { %1107 = vmatprep.mubr.msk.f32.mxu1 %vm422_vm0, %v383_v18 }
  0xa2   : > { %557 = vmatmul.mubr.f32.gmra.mrb[2].mxu0 %v382_v19 }
  0xa3   : > { %748 = vmatmul.mubr.f32.gmra.mrb[2].mxu1 %v382_v19  ;;  %1087 = vmatprep.mubr.msk.f32.mxu0 %vm422_vm0, %v385_v20 }
  0xa4   : > { %1108 = vmatprep.mubr.msk.f32.mxu1 %vm422_vm0, %v385_v20 }
  0xa6   : > { %563 = vmatmul.mubr.f32.gmra.mrb[4].mxu0 %v384_v21 }
  0xa7   : > { %754 = vmatmul.mubr.f32.gmra.mrb[4].mxu1 %v384_v21  ;;  %1088 = vmatprep.mubr.msk.f32.mxu0 %vm422_vm0, %v387_v22 }
  0xa8   : > { %1109 = vmatprep.mubr.msk.f32.mxu1 %vm422_vm0, %v387_v22 }
  0xaa   : > { %569 = vmatmul.mubr.f32.gmra.mrb[6].mxu0 %v386_v23 }
  0xab   : > { %760 = vmatmul.mubr.f32.gmra.mrb[6].mxu1 %v386_v23  ;;  %1089 = vmatprep.mubr.msk.f32.mxu0 %vm422_vm0, %v389_v24 }
  0xac   : > { %1110 = vmatprep.mubr.msk.f32.mxu1 %vm422_vm0, %v389_v24 }
  0xae   : > { %575 = vmatmul.mubr.f32.gmra.mrb[8].mxu0 %v388_v25 }
  0xaf   : > { %766 = vmatmul.mubr.f32.gmra.mrb[8].mxu1 %v388_v25  ;;  %1090 = vmatprep.mubr.msk.f32.mxu0 %vm422_vm0, %v391_v26 }
  0xb0   : > { %1111 = vmatprep.mubr.msk.f32.mxu1 %vm422_vm0, %v391_v26 }
  0xb2   : > { %581 = vmatmul.mubr.f32.gmra.mrb[10].mxu0 %v390_v27 }
  0xb3   : > { %772 = vmatmul.mubr.f32.gmra.mrb[10].mxu1 %v390_v27  ;;  %1091 = vmatprep.mubr.msk.f32.mxu0 %vm422_vm0, %v393_v28 }
  0xb4   : > { %1112 = vmatprep.mubr.msk.f32.mxu1 %vm422_vm0, %v393_v28 }
  0xb6   : > { %587 = vmatmul.mubr.f32.gmra.mrb[12].mxu0 %v392_v29 }
  0xb7   : > { %778 = vmatmul.mubr.f32.gmra.mrb[12].mxu1 %v392_v29  ;;  %1092 = vmatprep.mubr.msk.f32.mxu0 %vm422_vm0, %v395_v30 }
  0xb8   : > { %1113 = vmatprep.mubr.msk.f32.mxu1 %vm422_vm0, %v395_v30 }
  0xba   : > { %593 = vmatmul.mubr.f32.gmra.mrb[14].mxu0 %v394_v31 }
  0xbb   : > { %784 = vmatmul.mubr.f32.gmra.mrb[14].mxu1 %v394_v31  ;;  %1093 = vmatprep.mubr.msk.f32.mxu0 %vm422_vm0, %v397_v32 }
  0xbc   : > { %1114 = vmatprep.mubr.msk.f32.mxu1 %vm422_vm0, %v397_v32 }
  0xbe   : > { %599 = vmatmul.mubr.f32.gmra.mrb[16].mxu0 %v396_v33 }
  0xbf   : > { %790 = vmatmul.mubr.f32.gmra.mrb[16].mxu1 %v396_v33  ;;  %1094 = vmatprep.mubr.msk.f32.mxu0 %vm422_vm0, %v399_v34 }
  0xc0   : > { %1115 = vmatprep.mubr.msk.f32.mxu1 %vm422_vm0, %v399_v34 }
  0xc2   : > { %605 = vmatmul.mubr.f32.gmra.mrb[18].mxu0 %v398_v35 }
  0xc3   : > { %796 = vmatmul.mubr.f32.gmra.mrb[18].mxu1 %v398_v35  ;;  %1095 = vmatprep.mubr.msk.f32.mxu0 %vm422_vm0, %v401_v36 }
  0xc4   : > { %1116 = vmatprep.mubr.msk.f32.mxu1 %vm422_vm0, %v401_v36 }
  0xc6   : > { %611 = vmatmul.mubr.f32.gmra.mrb[20].mxu0 %v400_v37 }
  0xc7   : > { %802 = vmatmul.mubr.f32.gmra.mrb[20].mxu1 %v400_v37  ;;  %1096 = vmatprep.mubr.msk.f32.mxu0 %vm422_vm0, %v403_v38 }
  0xc8   : > { %1117 = vmatprep.mubr.msk.f32.mxu1 %vm422_vm0, %v403_v38 }
  0xca   : > { %617 = vmatmul.mubr.f32.gmra.mrb[22].mxu0 %v402_v39 }
  0xcb   : > { %808 = vmatmul.mubr.f32.gmra.mrb[22].mxu1 %v402_v39  ;;  %1097 = vmatprep.mubr.msk.f32.mxu0 %vm422_vm0, %v405_v40 }
  0xcc   : > { %1118 = vmatprep.mubr.msk.f32.mxu1 %vm422_vm0, %v405_v40 }
  0xce   : > { %623 = vmatmul.mubr.f32.gmra.mrb[24].mxu0 %v404_v41 }
  0xcf   : > { %814 = vmatmul.mubr.f32.gmra.mrb[24].mxu1 %v404_v41  ;;  %1098 = vmatprep.mubr.msk.f32.mxu0 %vm422_vm0, %v407_v42 }
  0xd0   : > { %1119 = vmatprep.mubr.msk.f32.mxu1 %vm422_vm0, %v407_v42 }
  0xd2   : > { %629 = vmatmul.mubr.f32.gmra.mrb[26].mxu0 %v406_v43 }
  0xd3   : > { %820 = vmatmul.mubr.f32.gmra.mrb[26].mxu1 %v406_v43  ;;  %1099 = vmatprep.mubr.msk.f32.mxu0 %vm422_vm0, %v409_v44 }
  0xd4   : > { %1120 = vmatprep.mubr.msk.f32.mxu1 %vm422_vm0, %v409_v44 }
  0xd6   : > { %635 = vmatmul.mubr.f32.gmra.mrb[28].mxu0 %v408_v45 }
  0xd7   : > { %826 = vmatmul.mubr.f32.gmra.mrb[28].mxu1 %v408_v45  ;;  %1100 = vmatprep.mubr.msk.f32.mxu0 %vm422_vm0, %v411_v46 }
  0xd8   : > { %1121 = vmatprep.mubr.msk.f32.mxu1 %vm422_vm0, %v411_v46 }
  0xda   : > { %641 = vmatmul.mubr.f32.gmra.mrb[30].mxu0 %v410_v47 }
  0xdb   : > { %832 = vmatmul.mubr.f32.gmra.mrb[30].mxu1 %v410_v47  ;;  %1101 = vmatprep.mubr.msk.f32.mxu0 %vm422_vm0, %v413_v48 }
  0xdc   : > { %1122 = vmatprep.mubr.msk.f32.mxu1 %vm422_vm0, %v413_v48 }
  0xde   : > { %647 = vmatmul.mubr.f32.gmra.mrb[32].mxu0 %v412_v49 }
  0xdf   : > { %838 = vmatmul.mubr.f32.gmra.mrb[32].mxu1 %v412_v49  ;;  %1102 = vmatprep.mubr.msk.f32.mxu0 %vm422_vm0, %v415_v50 }
  0xe0   : > { %1123 = vmatprep.mubr.msk.f32.mxu1 %vm422_vm0, %v415_v50 }
  0xe2   : > { %653 = vmatmul.mubr.f32.gmra.mrb[34].mxu0 %v414_v51 }
  0xe3   : > { %844 = vmatmul.mubr.f32.gmra.mrb[34].mxu1 %v414_v51  ;;  %1103 = vmatprep.mubr.msk.f32.mxu0 %vm422_vm0, %v417_v52 }
  0xe4   : > { %1124 = vmatprep.mubr.msk.f32.mxu1 %vm422_vm0, %v417_v52 }
  0xe6   : > { %659 = vmatmul.mubr.f32.gmra.mrb[36].mxu0 %v416_v53 }
  0xe7   : > { %850 = vmatmul.mubr.f32.gmra.mrb[36].mxu1 %v416_v53  ;;  %1104 = vmatprep.mubr.msk.f32.mxu0 %vm422_vm0, %v419_v54 }
  0xe8   : > { %1125 = vmatprep.mubr.msk.f32.mxu1 %vm422_vm0, %v419_v54 }
  0xea   : > { %665 = vmatmul.mubr.f32.gmra.mrb[38].mxu0 %v418_v55 }
  0xeb   : > { %856 = vmatmul.mubr.f32.gmra.mrb[38].mxu1 %v418_v55  ;;  %1105 = vmatprep.mubr.msk.f32.mxu0 %vm422_vm0, %v421_v56 }
  0xec   : > { %1126 = vmatprep.mubr.msk.f32.mxu1 %vm422_vm0, %v421_v56 }
  0xee   : > { %671 = vmatmul.mubr.f32.gmra.mrb[40].mxu0 %v420_v57 }
  0xef   : > { %862 = vmatmul.mubr.f32.gmra.mrb[40].mxu1 %v420_v57 }
 0x171   : > { %v552_v58 = vpop.f32.mrb[0].mxu0 }
 0x172   : > { %868 = vst [vmem:[%s1757_s20] sm:$0xff] %v552_v58  ;;  %v743_v59 = vpop.f32.mrb[0].mxu1  ;;  %v554_v60 = vpop.f32.mrb[1].mxu0 }
 0x173   : > { %870 = vst [vmem:[%s1757_s20 + $0x10] sm:$0xff] %v743_v59  ;;  %869 = vst [vmem:[%s1757_s20 + $0x8] sm:$0xff] %v554_v60  ;;  %v745_v61 = vpop.f32.mrb[1].mxu1 }
 0x174   : > { %871 = vst [vmem:[%s1757_s20 + $0x18] sm:$0xff] %v745_v61 }
 0x175   : > { %v558_v62 = vpop.f32.mrb[2].mxu0 }
 0x176   : > { %872 = vst [vmem:[%s1757_s20 + $0x20] sm:$0xff] %v558_v62  ;;  %v749_v63 = vpop.f32.mrb[2].mxu1  ;;  %v560_v0 = vpop.f32.mrb[3].mxu0 }
 0x177   : > { %874 = vst [vmem:[%s1757_s20 + $0x30] sm:$0xff] %v749_v63  ;;  %873 = vst [vmem:[%s1757_s20 + $0x28] sm:$0xff] %v560_v0  ;;  %v751_v1 = vpop.f32.mrb[3].mxu1 }
 0x178   : > { %875 = vst [vmem:[%s1757_s20 + $0x38] sm:$0xff] %v751_v1 }
 0x179   : > { %v564_v2 = vpop.f32.mrb[4].mxu0 }
 0x17a   : > { %876 = vst [vmem:[%s1757_s20 + $0x40] sm:$0xff] %v564_v2  ;;  %v755_v3 = vpop.f32.mrb[4].mxu1  ;;  %v566_v4 = vpop.f32.mrb[5].mxu0 }
 0x17b   : > { %878 = vst [vmem:[%s1757_s20 + $0x50] sm:$0xff] %v755_v3  ;;  %877 = vst [vmem:[%s1757_s20 + $0x48] sm:$0xff] %v566_v4  ;;  %v757_v5 = vpop.f32.mrb[5].mxu1 }
 0x17c   : > { %879 = vst [vmem:[%s1757_s20 + $0x58] sm:$0xff] %v757_v5 }
 0x17d   : > { %v570_v6 = vpop.f32.mrb[6].mxu0 }
 0x17e   : > { %880 = vst [vmem:[%s1757_s20 + $0x60] sm:$0xff] %v570_v6  ;;  %v761_v7 = vpop.f32.mrb[6].mxu1  ;;  %v572_v8 = vpop.f32.mrb[7].mxu0 }
 0x17f   : > { %882 = vst [vmem:[%s1757_s20 + $0x70] sm:$0xff] %v761_v7  ;;  %881 = vst [vmem:[%s1757_s20 + $0x68] sm:$0xff] %v572_v8  ;;  %v763_v9 = vpop.f32.mrb[7].mxu1 }
 0x180   : > { %883 = vst [vmem:[%s1757_s20 + $0x78] sm:$0xff] %v763_v9 }
 0x181   : > { %v576_v10 = vpop.f32.mrb[8].mxu0 }
 0x182   : > { %884 = vst [vmem:[%s1757_s20 + $0x80] sm:$0xff] %v576_v10  ;;  %v767_v11 = vpop.f32.mrb[8].mxu1  ;;  %v578_v12 = vpop.f32.mrb[9].mxu0 }
 0x183   : > { %886 = vst [vmem:[%s1757_s20 + $0x90] sm:$0xff] %v767_v11  ;;  %885 = vst [vmem:[%s1757_s20 + $0x88] sm:$0xff] %v578_v12  ;;  %v769_v13 = vpop.f32.mrb[9].mxu1 }
 0x184   : > { %887 = vst [vmem:[%s1757_s20 + $0x98] sm:$0xff] %v769_v13 }
 0x185   : > { %v582_v14 = vpop.f32.mrb[10].mxu0 }
 0x186   : > { %888 = vst [vmem:[%s1757_s20 + $0xa0] sm:$0xff] %v582_v14  ;;  %v773_v15 = vpop.f32.mrb[10].mxu1  ;;  %v584_v16 = vpop.f32.mrb[11].mxu0 }
 0x187   : > { %890 = vst [vmem:[%s1757_s20 + $0xb0] sm:$0xff] %v773_v15  ;;  %889 = vst [vmem:[%s1757_s20 + $0xa8] sm:$0xff] %v584_v16  ;;  %v775_v17 = vpop.f32.mrb[11].mxu1 }
 0x188   : > { %891 = vst [vmem:[%s1757_s20 + $0xb8] sm:$0xff] %v775_v17 }
 0x189   : > { %v588_v18 = vpop.f32.mrb[12].mxu0 }
 0x18a   : > { %892 = vst [vmem:[%s1757_s20 + $0xc0] sm:$0xff] %v588_v18  ;;  %v779_v19 = vpop.f32.mrb[12].mxu1  ;;  %v590_v20 = vpop.f32.mrb[13].mxu0 }
 0x18b   : > { %894 = vst [vmem:[%s1757_s20 + $0xd0] sm:$0xff] %v779_v19  ;;  %893 = vst [vmem:[%s1757_s20 + $0xc8] sm:$0xff] %v590_v20  ;;  %v781_v21 = vpop.f32.mrb[13].mxu1 }
 0x18c   : > { %895 = vst [vmem:[%s1757_s20 + $0xd8] sm:$0xff] %v781_v21 }
 0x18d   : > { %v594_v22 = vpop.f32.mrb[14].mxu0 }
 0x18e   : > { %896 = vst [vmem:[%s1757_s20 + $0xe0] sm:$0xff] %v594_v22  ;;  %v785_v23 = vpop.f32.mrb[14].mxu1  ;;  %v596_v24 = vpop.f32.mrb[15].mxu0 }
 0x18f   : > { %898 = vst [vmem:[%s1757_s20 + $0xf0] sm:$0xff] %v785_v23  ;;  %897 = vst [vmem:[%s1757_s20 + $0xe8] sm:$0xff] %v596_v24  ;;  %v787_v25 = vpop.f32.mrb[15].mxu1 }
 0x190   : > { %899 = vst [vmem:[%s1757_s20 + $0xf8] sm:$0xff] %v787_v25 }
 0x191   : > { %v600_v26 = vpop.f32.mrb[16].mxu0 }
 0x192   : > { %900 = vst [vmem:[%s1757_s20 + $0x100] sm:$0xff] %v600_v26  ;;  %v791_v27 = vpop.f32.mrb[16].mxu1  ;;  %v602_v28 = vpop.f32.mrb[17].mxu0 }
 0x193   : > { %902 = vst [vmem:[%s1757_s20 + $0x110] sm:$0xff] %v791_v27  ;;  %901 = vst [vmem:[%s1757_s20 + $0x108] sm:$0xff] %v602_v28  ;;  %v793_v29 = vpop.f32.mrb[17].mxu1 }
 0x194   : > { %903 = vst [vmem:[%s1757_s20 + $0x118] sm:$0xff] %v793_v29 }
 0x195   : > { %v606_v30 = vpop.f32.mrb[18].mxu0 }
 0x196   : > { %904 = vst [vmem:[%s1757_s20 + $0x120] sm:$0xff] %v606_v30  ;;  %v797_v31 = vpop.f32.mrb[18].mxu1  ;;  %v608_v32 = vpop.f32.mrb[19].mxu0 }
 0x197   : > { %906 = vst [vmem:[%s1757_s20 + $0x130] sm:$0xff] %v797_v31  ;;  %905 = vst [vmem:[%s1757_s20 + $0x128] sm:$0xff] %v608_v32  ;;  %v799_v33 = vpop.f32.mrb[19].mxu1 }
 0x198   : > { %907 = vst [vmem:[%s1757_s20 + $0x138] sm:$0xff] %v799_v33 }
 0x199   : > { %v612_v34 = vpop.f32.mrb[20].mxu0 }
 0x19a   : > { %908 = vst [vmem:[%s1757_s20 + $0x140] sm:$0xff] %v612_v34  ;;  %v803_v35 = vpop.f32.mrb[20].mxu1  ;;  %v614_v36 = vpop.f32.mrb[21].mxu0 }
 0x19b   : > { %910 = vst [vmem:[%s1757_s20 + $0x150] sm:$0xff] %v803_v35  ;;  %909 = vst [vmem:[%s1757_s20 + $0x148] sm:$0xff] %v614_v36  ;;  %v805_v37 = vpop.f32.mrb[21].mxu1 }
 0x19c   : > { %911 = vst [vmem:[%s1757_s20 + $0x158] sm:$0xff] %v805_v37 }
 0x19d   : > { %v618_v38 = vpop.f32.mrb[22].mxu0 }
 0x19e   : > { %912 = vst [vmem:[%s1757_s20 + $0x160] sm:$0xff] %v618_v38  ;;  %v809_v39 = vpop.f32.mrb[22].mxu1  ;;  %v620_v40 = vpop.f32.mrb[23].mxu0 }
 0x19f   : > { %914 = vst [vmem:[%s1757_s20 + $0x170] sm:$0xff] %v809_v39  ;;  %913 = vst [vmem:[%s1757_s20 + $0x168] sm:$0xff] %v620_v40  ;;  %v811_v41 = vpop.f32.mrb[23].mxu1 }
 0x1a0   : > { %915 = vst [vmem:[%s1757_s20 + $0x178] sm:$0xff] %v811_v41 }
 0x1a1   : > { %v624_v42 = vpop.f32.mrb[24].mxu0 }
 0x1a2   : > { %916 = vst [vmem:[%s1757_s20 + $0x180] sm:$0xff] %v624_v42  ;;  %v815_v43 = vpop.f32.mrb[24].mxu1  ;;  %v626_v44 = vpop.f32.mrb[25].mxu0 }
 0x1a3   : > { %918 = vst [vmem:[%s1757_s20 + $0x190] sm:$0xff] %v815_v43  ;;  %917 = vst [vmem:[%s1757_s20 + $0x188] sm:$0xff] %v626_v44  ;;  %v817_v45 = vpop.f32.mrb[25].mxu1 }
 0x1a4   : > { %919 = vst [vmem:[%s1757_s20 + $0x198] sm:$0xff] %v817_v45 }
 0x1a5   : > { %v630_v46 = vpop.f32.mrb[26].mxu0 }
 0x1a6   : > { %920 = vst [vmem:[%s1757_s20 + $0x1a0] sm:$0xff] %v630_v46  ;;  %v821_v47 = vpop.f32.mrb[26].mxu1  ;;  %v632_v48 = vpop.f32.mrb[27].mxu0 }
 0x1a7   : > { %922 = vst [vmem:[%s1757_s20 + $0x1b0] sm:$0xff] %v821_v47  ;;  %921 = vst [vmem:[%s1757_s20 + $0x1a8] sm:$0xff] %v632_v48  ;;  %v823_v49 = vpop.f32.mrb[27].mxu1 }
 0x1a8   : > { %923 = vst [vmem:[%s1757_s20 + $0x1b8] sm:$0xff] %v823_v49 }
 0x1a9   : > { %v636_v50 = vpop.f32.mrb[28].mxu0 }
 0x1aa   : > { %924 = vst [vmem:[%s1757_s20 + $0x1c0] sm:$0xff] %v636_v50  ;;  %v827_v51 = vpop.f32.mrb[28].mxu1  ;;  %v638_v52 = vpop.f32.mrb[29].mxu0 }
 0x1ab   : > { %926 = vst [vmem:[%s1757_s20 + $0x1d0] sm:$0xff] %v827_v51  ;;  %925 = vst [vmem:[%s1757_s20 + $0x1c8] sm:$0xff] %v638_v52  ;;  %v829_v53 = vpop.f32.mrb[29].mxu1 }
 0x1ac   : > { %927 = vst [vmem:[%s1757_s20 + $0x1d8] sm:$0xff] %v829_v53 }
 0x1ad   : > { %v642_v54 = vpop.f32.mrb[30].mxu0 }
 0x1ae   : > { %928 = vst [vmem:[%s1757_s20 + $0x1e0] sm:$0xff] %v642_v54  ;;  %v833_v55 = vpop.f32.mrb[30].mxu1  ;;  %v644_v56 = vpop.f32.mrb[31].mxu0 }
 0x1af   : > { %930 = vst [vmem:[%s1757_s20 + $0x1f0] sm:$0xff] %v833_v55  ;;  %929 = vst [vmem:[%s1757_s20 + $0x1e8] sm:$0xff] %v644_v56  ;;  %v835_v57 = vpop.f32.mrb[31].mxu1 }
 0x1b0   : > { %931 = vst [vmem:[%s1757_s20 + $0x1f8] sm:$0xff] %v835_v57 }
 0x1b1   : > { %v648_v58 = vpop.f32.mrb[32].mxu0 }
 0x1b2   : > { %932 = vst [vmem:[%s1757_s20 + $0x200] sm:$0xff] %v648_v58  ;;  %v839_v59 = vpop.f32.mrb[32].mxu1  ;;  %v650_v60 = vpop.f32.mrb[33].mxu0 }
 0x1b3   : > { %934 = vst [vmem:[%s1757_s20 + $0x210] sm:$0xff] %v839_v59  ;;  %933 = vst [vmem:[%s1757_s20 + $0x208] sm:$0xff] %v650_v60  ;;  %v841_v61 = vpop.f32.mrb[33].mxu1 }
 0x1b4   : > { %935 = vst [vmem:[%s1757_s20 + $0x218] sm:$0xff] %v841_v61 }
 0x1b5   : > { %v654_v62 = vpop.f32.mrb[34].mxu0 }
 0x1b6   : > { %936 = vst [vmem:[%s1757_s20 + $0x220] sm:$0xff] %v654_v62  ;;  %v845_v63 = vpop.f32.mrb[34].mxu1  ;;  %v656_v0 = vpop.f32.mrb[35].mxu0 }
 0x1b7   : > { %938 = vst [vmem:[%s1757_s20 + $0x230] sm:$0xff] %v845_v63  ;;  %937 = vst [vmem:[%s1757_s20 + $0x228] sm:$0xff] %v656_v0  ;;  %v847_v1 = vpop.f32.mrb[35].mxu1 }
 0x1b8   : > { %939 = vst [vmem:[%s1757_s20 + $0x238] sm:$0xff] %v847_v1 }
 0x1b9   : > { %v660_v2 = vpop.f32.mrb[36].mxu0 }
 0x1ba   : > { %940 = vst [vmem:[%s1757_s20 + $0x240] sm:$0xff] %v660_v2  ;;  %v851_v3 = vpop.f32.mrb[36].mxu1  ;;  %v662_v4 = vpop.f32.mrb[37].mxu0 }
 0x1bb   : > { %942 = vst [vmem:[%s1757_s20 + $0x250] sm:$0xff] %v851_v3  ;;  %941 = vst [vmem:[%s1757_s20 + $0x248] sm:$0xff] %v662_v4  ;;  %v853_v5 = vpop.f32.mrb[37].mxu1 }
 0x1bc   : > { %943 = vst [vmem:[%s1757_s20 + $0x258] sm:$0xff] %v853_v5 }
 0x1bd   : > { %v666_v6 = vpop.f32.mrb[38].mxu0 }
 0x1be   : > { %944 = vst [vmem:[%s1757_s20 + $0x260] sm:$0xff] %v666_v6  ;;  %v857_v7 = vpop.f32.mrb[38].mxu1  ;;  %v668_v8 = vpop.f32.mrb[39].mxu0  ;;  %959 = sbr.rel (!%p1935_p10) target bundleno = 483 (0x1e3), region = 40 }
 0x1bf   : > { %946 = vst [vmem:[%s1757_s20 + $0x270] sm:$0xff] %v857_v7  ;;  %945 = vst [vmem:[%s1757_s20 + $0x268] sm:$0xff] %v668_v8  ;;  %v859_v9 = vpop.f32.mrb[39].mxu1 }
 0x1c0   : > { %947 = vst [vmem:[%s1757_s20 + $0x278] sm:$0xff] %v859_v9 }
 0x1c1   : > { %v672_v10 = vpop.f32.mrb[40].mxu0 }
 0x1c2   : > { %948 = vst [vmem:[%s1757_s20 + $0x280] sm:$0xff] %v672_v10  ;;  %v863_v11 = vpop.f32.mrb[40].mxu1  ;;  %v674_v12 = vpop.f32.mrb[41].mxu0 }
 0x1c3   : > { %950 = vst [vmem:[%s1757_s20 + $0x290] sm:$0xff] %v863_v11  ;;  %949 = vst [vmem:[%s1757_s20 + $0x288] sm:$0xff] %v674_v12  ;;  %v865_v13 = vpop.f32.mrb[41].mxu1 }
 0x1c4   : > { %951 = vst [vmem:[%s1757_s20 + $0x298] sm:$0xff] %v865_v13 }
 0x1c5   : > { %s1947_s5 = smov (!%p962_p12, %s961_s5), 4 }
 0x1c6   : > { %s1850_s29 = smul.u32 2688, %s1947_s5 }
 0x1c8   : > { %s966_s6 = ssub.s32 10752, %s1850_s29 }
 0x1c9   : > { %967 = vsyncadd %s953_s22, %s966_s6  ;;  %p1128_p13 = scmp.ne.s32.totalorder %s1850_s29, 0  ;;  %s1136_s23 = sshll.u32 %s1425_s12, 9 }
 0x1ca   : > { %s1860_s21 = scalar_lea.hbm %s1919_s2, %s1136_s23  ;;  %s1130_s8 = sshll.u32 %s1947_s5, 3 }
 0x1cb   : > { %s975_s15 = sshll.u32 %s1757_s20, 4  ;;  %s1441_s27 = smov [#allocation7]   ;;  %s1864_s15 = int_to_ptr.vmem [resolvable:$true] %s975_s15 }
 0x1cc   : > { %s1347_s30 = scalar_lea.vmem %s1864_s15, %s1850_s29  ;;  %s1351_s3 = sshll.u32 %s1441_s27, 4  ;;  %s1352_s3 = int_to_ptr.vmem [resolvable:$false] %s1351_s3 }
 0x1cd   : > { %p1348_p1 = scmp.ne.s32.totalorder %s1864_s15, %s1347_s30  ;;  %s1353_s12 = scalar_lea.vmem %s1352_s3, 21504 }
 0x1ce   : > { %p1354_p8 = scmp.lt.s32.totalorder %s1864_s15, %s1352_s3  ;;  %p1355_p9 = scmp.lt.s32.totalorder %s1353_s12, %s1347_s30 }
 0x1cf   : > { %p1349_p11 = pnand %p1348_p1, %p1128_p13 }
 0x1d0   : > { %p1356_p2 = por %p1355_p9, %p1354_p8 }
 0x1d1   : > { %p1350_p4 = pneg %p1349_p11 }
 0x1d3   : > { %p1357_p6 = pnand %p1356_p2, %p1350_p4 }
 0x1d5   : > { %1360 = shalt.err (!%p1357_p6)
}
 0x1d6   : > { %s1361_s28 = scalar_lea.hbm %s1860_s21, %s1850_s29  ;;  %s1365_s20 = scalar_lea.hbm %s1919_s2, 18816 }
 0x1d7   : > { %p1362_p0 = scmp.ne.s32.totalorder %s1860_s21, %s1361_s28  ;;  %p1366_p10 = scmp.lt.u32.totalorder %s1860_s21, %s1919_s2 }
 0x1d8   : > { %p1367_p12 = scmp.lt.u32.totalorder %s1365_s20, %s1361_s28  ;;  %p1369_p11 = scmp.lt.u32.totalorder %s1361_s28, %s1860_s21 }
 0x1d9   : > { %p1363_p7 = pnand %p1362_p0, %p1128_p13 }
 0x1da   : > { %p1368_p1 = por %p1367_p12, %p1366_p10 }
 0x1db   : > { %p1364_p5 = pneg %p1363_p7 }
 0x1dc   : > { %p1370_p4 = por %p1369_p11, %p1368_p1 }
 0x1de   : > { %p1371_p8 = pnand %p1370_p4, %p1364_p5 }
 0x1e0   : > { %1374 = shalt.err (!%p1371_p8)
}
 0x1e1   : > { %s1442_s23 = smov 512   ;;  %s1443_s16 = smov 896  }
 0x1e2   : > { %981 = dma.vmem_to_hbm [thread:$0]  (%p1128_p13), %s1864_s15, %s1850_s29, %s1860_s21, %s953_s22, %s1442_s23, %s1443_s16, %s1130_s8  }
 0x1e3 PF: > { %s990_s18 = sand.u32 1, %s1413_s9   ;;  %p1936_p9 = scmp.ne.s32.totalorder %s1928_s25, 0 }
 0x1e4   : > { %s991_s30 = scalar_lea.sflag [#allocation4], %s990_s18 }
 0x1e5   : > { %p1230_p2 = pnand %p1076_p3, %p1936_p9 }
 0x1e7   : > { %1408 = dma.done.wait (!%p1230_p2), %s991_s30, 10752  }
 0x1e8   : > { %1410 = vsyncadd (!%p1230_p2), %s991_s30, 4294956544  ;;  %s19_s14 = sadd.s32 1, %s1433_s14   ;;  %s1937_s9 = smov %s1417_s10 }
 0x1e9   : > { %p16_p6 = scmp.ge.s32.totalorder %s19_s14, 4   ;;  %s1938_s10 = smov %s1421_s11 }
 0x1ea   : > { %s1939_s11 = smov %s1521_s24  ;;  %s1940_s12 = smov %s1429_s13 }
 0x1eb   : > { %s1941_s13 = smov %s1943_s17  ;;  %18 = sbr.rel (!%p16_p6) target bundleno = 7 (0x7), region = 77 }
 0x1f2   :  { %996 = vsyncpa [#allocation3], 1 }
 0x1f3   :  { %998 = vsyncpa [#allocation3 + $0x1], 1 }
 0x1f4   :  { %999 = vsyncpa [#allocation6], 1 }
 0x1f5   :  { %1000 = vsyncpa [#allocation4], 1 }
 0x1f6   :  { %1002 = vsyncpa [#allocation4 + $0x1], 1 }

</bundles_post_ra>
